<compile_context>
chip_gen: v7x
topology: tpu7x:2x2x1
jax: 0.10.0
libtpu: 0.0.40
codegen_flags: <defaults>
</compile_context>

<pallas_src>
import jax
import jax.numpy as jnp
from jax.experimental import pallas as pl
from jax.experimental.pallas import tpu as pltpu

LANE = 128
SUBLANE = 8
TB_MAX = 2048  # max batch-tile rows; with narrow x/out tiles this is << VMEM


def _cdiv(a, b):
    return -(-a // b)


def _round_up(n, m):
    return _cdiv(n, m) * m


# ----------------------------------------------------------------------------
# Kernel: all three layers fused; h1/h2 never leave vregs.
# ----------------------------------------------------------------------------
def fcnet_kernel(x_ref, w1_ref, b1_ref, w2_ref, b2_ref, w3_ref, b3_ref, o_ref):
    # fc1 + ReLU (cast x to weight dtype in-kernel; f32 MXU accumulate)
    x = x_ref[...].astype(w1_ref.dtype)
    h1 = jnp.dot(x, w1_ref[...], preferred_element_type=jnp.float32)
    h1 = jnp.maximum(h1 + b1_ref[...], 0.0)
    # fc2 + ReLU
    h2 = jnp.dot(h1.astype(w2_ref.dtype), w2_ref[...],
                 preferred_element_type=jnp.float32)
    h2 = jnp.maximum(h2 + b2_ref[...], 0.0)
    # fc3 (no activation); w3/b3 already at natural dim_out width
    h3 = jnp.dot(h2.astype(w3_ref.dtype), w3_ref[...],
                 preferred_element_type=jnp.float32)
    o_ref[...] = (h3 + b3_ref[...]).astype(o_ref.dtype)


# ----------------------------------------------------------------------------
# Parameters (mimic nn.Linear init), padding & pre-casting (done once).
# ----------------------------------------------------------------------------
def init_params(key, num_classes, dim_hidden=20, dim_out=2, dtype=jnp.float32):
    """Logical params; weights stored [in_features, out_features] (y = x @ W + b)."""
    ks = jax.random.split(key, 6)

    def lin(kw, kb, fan_in, fan_out):
        bound = 1.0 / jnp.sqrt(fan_in)
        w = jax.random.uniform(kw, (fan_in, fan_out), dtype, -bound, bound)
        b = jax.random.uniform(kb, (1, fan_out), dtype, -bound, bound)
        return w, b

    w1, b1 = lin(ks[0], ks[1], num_classes, dim_hidden)
    w2, b2 = lin(ks[2], ks[3], dim_hidden, dim_hidden)
    w3, b3 = lin(ks[4], ks[5], dim_hidden, dim_out)
    return {"w1": w1, "b1": b1, "w2": w2, "b2": b2, "w3": w3, "b3": b3}


def pad_params(params, param_dtype=jnp.bfloat16):
    """Pad only the hidden dim to 128 lanes (VMEM-resident tensors) and pre-cast
    weights once. num_classes and dim_out stay at natural widths so the HBM
    x / out streams stay narrow. Biases stay f32 (f32 epilogue in-kernel)."""
    dim_hidden = params["w1"].shape[1]
    h_pad = _round_up(dim_hidden, LANE)

    def pad_cols(a, cols):
        return jnp.pad(a, ((0, 0), (0, cols - a.shape[1])))

    def pad_rows(a, rows):
        return jnp.pad(a, ((0, rows - a.shape[0]), (0, 0)))

    return {
        "w1": pad_cols(params["w1"], h_pad).astype(param_dtype),              # [C, Hp]
        "b1": pad_cols(params["b1"], h_pad).astype(jnp.float32),              # [1, Hp]
        "w2": pad_rows(pad_cols(params["w2"], h_pad), h_pad).astype(param_dtype),  # [Hp, Hp]
        "b2": pad_cols(params["b2"], h_pad).astype(jnp.float32),              # [1, Hp]
        "w3": pad_rows(params["w3"], h_pad).astype(param_dtype),              # [Hp, O]
        "b3": params["b3"].astype(jnp.float32),                               # [1, O]
    }


def _pick_batch_tile(B):
    """Batch tile: single step for small B; for large B an even number of
    balanced steps (<= TB_MAX rows each) so both v7x TensorCores get work and
    row padding stays minimal."""
    if B < 1024:
        return _round_up(max(B, SUBLANE), SUBLANE)
    n = max(2, _cdiv(B, TB_MAX))
    if n % 2:
        n += 1  # even step count balances the 2-TC split on v7x
    return _round_up(_cdiv(B, n), SUBLANE)


# ----------------------------------------------------------------------------
# Forward wrapper.
# ----------------------------------------------------------------------------
@jax.jit
def fcnet_forward(x, padded):
    """x: [B, num_classes]; padded: output of pad_params. Returns [B, dim_out]."""
    w1, b1, w2, b2, w3, b3 = (padded[k] for k in ("w1", "b1", "w2", "b2", "w3", "b3"))
    B, num_classes = x.shape
    h_pad = w1.shape[1]
    dim_out = w3.shape[1]

    tb = _pick_batch_tile(B)
    b_pad = _round_up(B, tb)
    x_p = x if b_pad == B else jnp.pad(x, ((0, b_pad - B), (0, 0)))

    const = lambda i: (0, 0)  # resident weights/biases: same block every step

    out = pl.pallas_call(
        fcnet_kernel,
        out_shape=jax.ShapeDtypeStruct((b_pad, dim_out), x.dtype),
        grid=(b_pad // tb,),
        in_specs=[
            pl.BlockSpec((tb, num_classes), lambda i: (i, 0)),  # x: natural width stream
            pl.BlockSpec((num_classes, h_pad), const),          # w1 (VMEM resident)
            pl.BlockSpec((1, h_pad), const),                    # b1
            pl.BlockSpec((h_pad, h_pad), const),                # w2
            pl.BlockSpec((1, h_pad), const),                    # b2
            pl.BlockSpec((h_pad, dim_out), const),              # w3 (natural out width)
            pl.BlockSpec((1, dim_out), const),                  # b3
        ],
        out_specs=pl.BlockSpec((tb, dim_out), lambda i: (i, 0)),  # natural-width output
        compiler_params=pltpu.CompilerParams(
            dimension_semantics=("parallel",),  # shards batch steps across v7x's 2 TCs
        ),
    )(x_p, w1, b1, w2, b2, w3, b3)

    return out if b_pad == B else out[:B]


def fcnet_reference(x, p):
    h1 = jnp.maximum(x @ p["w1"] + p["b1"], 0.0)
    h2 = jnp.maximum(h1 @ p["w2"] + p["b2"], 0.0)
    return h2 @ p["w3"] + p["b3"]


if __name__ == "__main__":
    key = jax.random.PRNGKey(0)
    k_x, k_p, k_x2 = jax.random.split(key, 3)

    # FCNet(args.num_classes=10, dim_hidden=20, dim_out=2); small batch.
    batch, num_classes, dim_hidden, dim_out = 8, 10, 20, 2

    x = jax.random.normal(k_x, (batch, num_classes), dtype=jnp.float32)
    params = init_params(k_p, num_classes, dim_hidden, dim_out)
    ref = fcnet_reference(x, params)

    # f32-weight path (tolerance accounts for MXU default-precision truncation).
    out_f32 = jax.block_until_ready(fcnet_forward(x, pad_params(params, jnp.float32)))
    assert out_f32.shape == (batch, dim_out)
    assert jnp.allclose(out_f32, ref, atol=1e-2, rtol=1e-2), "f32 path mismatch"

    # Default bf16-operand path (f32 accumulate + f32 epilogue).
    padded = pad_params(params)  # bf16 weights
    out_bf16 = jax.block_until_ready(fcnet_forward(x, padded))
    assert out_bf16.shape == (batch, dim_out)
    assert jnp.allclose(out_bf16, ref, atol=5e-2, rtol=5e-2), "bf16 path mismatch"

    # Larger ragged batch: exercises the multi-step "parallel" grid + row padding.
    x2 = jax.random.normal(k_x2, (1030, num_classes), dtype=jnp.float32)
    out2 = jax.block_until_ready(fcnet_forward(x2, padded))
    ref2 = fcnet_reference(x2, params)
    assert out2.shape == (1030, dim_out)
    assert jnp.allclose(out2, ref2, atol=5e-2, rtol=5e-2), "large-batch mismatch"

    print("KERNEL_OK")
</pallas_src>

<mosaic_0001>
module attributes {stable_mosaic.version = 11 : i64} {
  func.func @fcnet_kernel(%arg0: i32, %arg1: memref<8x10xf32, #tpu.memory_space<vmem>>, %arg2: memref<10x128xf32, #tpu.memory_space<vmem>>, %arg3: memref<1x128xf32, #tpu.memory_space<vmem>>, %arg4: memref<128x128xf32, #tpu.memory_space<vmem>>, %arg5: memref<1x128xf32, #tpu.memory_space<vmem>>, %arg6: memref<128x2xf32, #tpu.memory_space<vmem>>, %arg7: memref<1x2xf32, #tpu.memory_space<vmem>>, %arg8: memref<8x2xf32, #tpu.memory_space<vmem>>) attributes {dimension_semantics = [#tpu.dimension_semantics<parallel>], iteration_bounds = array<i64: 1>, scalar_prefetch = 0 : i64, scratch_operands = 0 : i64, tpu.core_type = #tpu.core_type<tc>, window_params = [{transform_indices = @transform_0, window_bounds = array<i64: 8, 10>}, {pipeline_mode = #tpu.pipeline_mode<synchronous>, transform_indices = @transform_1, window_bounds = array<i64: 10, 128>}, {pipeline_mode = #tpu.pipeline_mode<synchronous>, transform_indices = @transform_2, window_bounds = array<i64: 1, 128>}, {pipeline_mode = #tpu.pipeline_mode<synchronous>, transform_indices = @transform_3, window_bounds = array<i64: 128, 128>}, {pipeline_mode = #tpu.pipeline_mode<synchronous>, transform_indices = @transform_4, window_bounds = array<i64: 1, 128>}, {pipeline_mode = #tpu.pipeline_mode<synchronous>, transform_indices = @transform_5, window_bounds = array<i64: 128, 2>}, {pipeline_mode = #tpu.pipeline_mode<synchronous>, transform_indices = @transform_6, window_bounds = array<i64: 1, 2>}, {transform_indices = @transform_7, window_bounds = array<i64: 8, 2>}]} {
    %c0 = arith.constant 0 : index
    %c0_0 = arith.constant 0 : index
    %0 = vector.load %arg1[%c0, %c0_0] : memref<8x10xf32, #tpu.memory_space<vmem>>, vector<8x10xf32>
    %c0_1 = arith.constant 0 : index
    %c0_2 = arith.constant 0 : index
    %1 = vector.load %arg2[%c0_1, %c0_2] : memref<10x128xf32, #tpu.memory_space<vmem>>, vector<10x128xf32>
    %cst = arith.constant dense<0.000000e+00> : vector<8x128xf32>
    %2 = tpu.matmul %0, %1, %cst {dimension_numbers = #tpu.dot_dimension_numbers<[1], [0], [0], [1], [0, 0, 1, 1], [], []>} : vector<8x10xf32>, vector<10x128xf32>, vector<8x128xf32> -> vector<8x128xf32>
    %c0_3 = arith.constant 0 : index
    %c0_4 = arith.constant 0 : index
    %3 = vector.load %arg3[%c0_3, %c0_4] : memref<1x128xf32, #tpu.memory_space<vmem>>, vector<1x128xf32>
    %4 = vector.broadcast %3 : vector<1x128xf32> to vector<8x128xf32>
    %5 = arith.addf %2, %4 : vector<8x128xf32>
    %cst_5 = arith.constant 0.000000e+00 : f32
    %6 = vector.broadcast %cst_5 : f32 to vector<8x128xf32>
    %7 = arith.maximumf %5, %6 : vector<8x128xf32>
    %c0_6 = arith.constant 0 : index
    %c0_7 = arith.constant 0 : index
    %8 = vector.load %arg4[%c0_6, %c0_7] : memref<128x128xf32, #tpu.memory_space<vmem>>, vector<128x128xf32>
    %cst_8 = arith.constant dense<0.000000e+00> : vector<8x128xf32>
    %9 = tpu.matmul %7, %8, %cst_8 {dimension_numbers = #tpu.dot_dimension_numbers<[1], [0], [0], [1], [0, 0, 1, 1], [], []>} : vector<8x128xf32>, vector<128x128xf32>, vector<8x128xf32> -> vector<8x128xf32>
    %c0_9 = arith.constant 0 : index
    %c0_10 = arith.constant 0 : index
    %10 = vector.load %arg5[%c0_9, %c0_10] : memref<1x128xf32, #tpu.memory_space<vmem>>, vector<1x128xf32>
    %11 = vector.broadcast %10 : vector<1x128xf32> to vector<8x128xf32>
    %12 = arith.addf %9, %11 : vector<8x128xf32>
    %cst_11 = arith.constant 0.000000e+00 : f32
    %13 = vector.broadcast %cst_11 : f32 to vector<8x128xf32>
    %14 = arith.maximumf %12, %13 : vector<8x128xf32>
    %c0_12 = arith.constant 0 : index
    %c0_13 = arith.constant 0 : index
    %15 = vector.load %arg6[%c0_12, %c0_13] : memref<128x2xf32, #tpu.memory_space<vmem>>, vector<128x2xf32>
    %cst_14 = arith.constant dense<0.000000e+00> : vector<8x2xf32>
    %16 = tpu.matmul %14, %15, %cst_14 {dimension_numbers = #tpu.dot_dimension_numbers<[1], [0], [0], [1], [0, 0, 1, 1], [], []>} : vector<8x128xf32>, vector<128x2xf32>, vector<8x2xf32> -> vector<8x2xf32>
    %c0_15 = arith.constant 0 : index
    %c0_16 = arith.constant 0 : index
    %17 = vector.load %arg7[%c0_15, %c0_16] : memref<1x2xf32, #tpu.memory_space<vmem>>, vector<1x2xf32>
    %18 = vector.broadcast %17 : vector<1x2xf32> to vector<8x2xf32>
    %19 = arith.addf %16, %18 : vector<8x2xf32>
    %c0_17 = arith.constant 0 : index
    %c0_18 = arith.constant 0 : index
    %20 = vector.load %arg8[%c0_17, %c0_18] : memref<8x2xf32, #tpu.memory_space<vmem>>, vector<8x2xf32>
    tpu.vector_store %arg8[%c0_17, %c0_18], %19 {strides = array<i32>} : memref<8x2xf32, #tpu.memory_space<vmem>>, vector<8x2xf32>,
    return
  }
  func.func @transform_0(%arg0: i32) -> (i32, i32) {
    %c0_i32 = arith.constant 0 : i32
    %c0_i32_0 = arith.constant 0 : i32
    return %arg0, %c0_i32 : i32, i32
  }
  func.func @transform_1(%arg0: i32) -> (i32, i32) {
    %c0_i32 = arith.constant 0 : i32
    %c0_i32_0 = arith.constant 0 : i32
    %c0_i32_1 = arith.constant 0 : i32
    return %c0_i32, %c0_i32_0 : i32, i32
  }
  func.func @transform_2(%arg0: i32) -> (i32, i32) {
    %c0_i32 = arith.constant 0 : i32
    %c0_i32_0 = arith.constant 0 : i32
    %c0_i32_1 = arith.constant 0 : i32
    return %c0_i32, %c0_i32_0 : i32, i32
  }
  func.func @transform_3(%arg0: i32) -> (i32, i32) {
    %c0_i32 = arith.constant 0 : i32
    %c0_i32_0 = arith.constant 0 : i32
    %c0_i32_1 = arith.constant 0 : i32
    return %c0_i32, %c0_i32_0 : i32, i32
  }
  func.func @transform_4(%arg0: i32) -> (i32, i32) {
    %c0_i32 = arith.constant 0 : i32
    %c0_i32_0 = arith.constant 0 : i32
    %c0_i32_1 = arith.constant 0 : i32
    return %c0_i32, %c0_i32_0 : i32, i32
  }
  func.func @transform_5(%arg0: i32) -> (i32, i32) {
    %c0_i32 = arith.constant 0 : i32
    %c0_i32_0 = arith.constant 0 : i32
    %c0_i32_1 = arith.constant 0 : i32
    return %c0_i32, %c0_i32_0 : i32, i32
  }
  func.func @transform_6(%arg0: i32) -> (i32, i32) {
    %c0_i32 = arith.constant 0 : i32
    %c0_i32_0 = arith.constant 0 : i32
    %c0_i32_1 = arith.constant 0 : i32
    return %c0_i32, %c0_i32_0 : i32, i32
  }
  func.func @transform_7(%arg0: i32) -> (i32, i32) {
    %c0_i32 = arith.constant 0 : i32
    %c0_i32_0 = arith.constant 0 : i32
    return %arg0, %c0_i32 : i32, i32
  }
}

</mosaic_0001>

<bundles_post_ra>
// kernel: fcnet_forward.1
= control target key start
LH: loop header
LB: loop body
LE: loop exit
PB: predicated region body
PF: predicated region fallthrough
CT: control target
= control target key end

     0   :  { %12 = vsyncpa [#allocation3], 0  ;;  %s521_s24 = smov [#allocation2]   ;;  %s712_s0 = inlined_call_operand.hbm [shape: f32[8,10], index: 0, kind: input, shape index: {}]   ;;  %s713_s1 = inlined_call_operand.vmem [shape: f32[10,128], index: 1, kind: input, shape index: {}]   ;;  %s714_s2 = inlined_call_operand.vmem [shape: f32[1,128], index: 2, kind: input, shape index: {}]   ;;  %s715_s3 = inlined_call_operand.vmem [shape: f32[128,128], index: 3, kind: input, shape index: {}]   ;;  %s716_s4 = inlined_call_operand.vmem [shape: f32[1,128], index: 4, kind: input, shape index: {}]   ;;  %s717_s5 = inlined_call_operand.vmem [shape: f32[128,2], index: 5, kind: input, shape index: {}]   ;;  %s718_s6 = inlined_call_operand.vmem [shape: f32[1,2], index: 6, kind: input, shape index: {}]   ;;  %s719_s7 = inlined_call_operand.vmem [shape: f32[8,2], index: 7, kind: output, shape index: {}]  }
   0x1   :  { %s19_s25 = sshll.u32 %s521_s24, 4  ;;  %s497_s28 = scalar_lea.hbm %s712_s0, 128  ;;  %s20_s25 = int_to_ptr.vmem [resolvable:$true] %s19_s25 }
   0x2   :  { %p498_p0 = scmp.ne.s32.totalorder %s712_s0, %s497_s28  ;;  %p501_p1 = scmp.lt.u32.totalorder %s497_s28, %s712_s0 }
   0x4   :  { %p503_p2 = pnand %p501_p1, %p498_p0 }
   0x6   :  { %506 = shalt.err (!%p503_p2)
}
   0x7   :  { %s507_s10 = scalar_lea.vmem %s20_s25, 128  ;;  %p512_p4 = scmp.lt.s32.totalorder %s20_s25, %s20_s25 }
   0x8   :  { %p508_p3 = scmp.ne.s32.totalorder %s20_s25, %s507_s10  ;;  %p513_p5 = scmp.lt.s32.totalorder %s507_s10, %s507_s10 }
   0xa   :  { %p514_p6 = por %p513_p5, %p512_p4 }
   0xc   :  { %p515_p7 = pnand %p514_p6, %p508_p3 }
   0xe   :  { %518 = shalt.err (!%p515_p7)
}
   0xf   :  { %22 = dma.hbm_to_vmem [thread:$0]  %s712_s0, 128, %s20_s25, [#allocation3]  }
  0x10   :  { %519 = dma.done.wait [#allocation3], 128  }
  0x11   :  { %520 = vsyncadd [#allocation3], 4294967168  ;;  %v522_v0 = vmov 0.0|0.0   ;;  %vm523_vm0 = vmmov 0   ;;  %v524_v1 = vmov 0.0   ;;  %vm52_vm1 = vcmask 1041408  }
  0x12   :  { %440 = vmatprep.subr.bf16.mxu0 %v522_v0  ;;  %444 = vmatprep.subr.bf16.mxu1 %v522_v0  ;;  %v39_v2 = vld [vmem:[%s713_s1] sm:$0xff]  ;;  %v40_v3 = vld [vmem:[%s713_s1 + $0x8] sm:$0x3]  ;;  %vm525_vm2 = vmmov 1   ;;  %v129_v7 = vld [vmem:[%s715_s3 + $0x10] sm:$0xff]  ;;  %vm48_vm4 = vcmask 80896  }
  0x13   :  { %367 = vmatprep.mubr.msk.f32.mxu0 %vm523_vm0, %v524_v1  ;;  %402 = vmatprep.mubr.msk.f32.mxu1 %vm523_vm0, %v524_v1  ;;  %vm442_vm3 = vmpackc.low %vm52_vm1, %vm525_vm2  ;;  %v441_v4 = vpack.c.bf16 %v40_v3, %v39_v2  ;;  %v127_v5 = vld [vmem:[%s715_s3] sm:$0xff]  ;;  %v128_v6 = vld [vmem:[%s715_s3 + $0x8] sm:$0xff]  ;;  %vm314_vm5 = vcmask 15360  }
  0x14   :  { %v445_v8 = vpack.c.bf16 %v128_v6, %v127_v5  ;;  %v130_v9 = vld [vmem:[%s715_s3 + $0x18] sm:$0xff]  ;;  %v38_v10 = vld [vmem:[#allocation2] sm:$0xff]  ;;  %v132_v13 = vld [vmem:[%s715_s3 + $0x28] sm:$0xff] }
  0x15   :  { %443 = vmatpush3.bf16.msk.msra.mxu0 %vm442_vm3, %v441_v4  ;;  %v448_v11 = vpack.c.bf16 %v130_v9, %v129_v7  ;;  %v131_v12 = vld [vmem:[%s715_s3 + $0x20] sm:$0xff]  ;;  %v133_v15 = vld [vmem:[%s715_s3 + $0x30] sm:$0xff]  ;;  %v134_v16 = vld [vmem:[%s715_s3 + $0x38] sm:$0xff] }
  0x16   :  { %446 = vmatpush3.bf16.msra.mxu1 %v445_v8  ;;  %468 = vmatprep.subr.bf16.mxu0 %v522_v0  ;;  %v451_v14 = vpack.c.bf16 %v132_v13, %v131_v12  ;;  %v454_v17 = vpack.c.bf16 %v134_v16, %v133_v15  ;;  %v135_v18 = vld [vmem:[%s715_s3 + $0x40] sm:$0xff]  ;;  %v136_v19 = vld [vmem:[%s715_s3 + $0x48] sm:$0xff]  ;;  %v137_v21 = vld [vmem:[%s715_s3 + $0x50] sm:$0xff] }
  0x17   :  { %447 = vmatprep.subr.bf16.mxu1 %v522_v0  ;;  %v457_v20 = vpack.c.bf16 %v136_v19, %v135_v18  ;;  %v138_v22 = vld [vmem:[%s715_s3 + $0x58] sm:$0xff]  ;;  %v139_v24 = vld [vmem:[%s715_s3 + $0x60] sm:$0xff]  ;;  %v140_v25 = vld [vmem:[%s715_s3 + $0x68] sm:$0xff] }
  0x18   :  { %368 = vmatmul.mubr.msk.f32.vlgmr.msra.gmra.mrb[0].mxu0 %vm48_vm4, %v38_v10  ;;  %v460_v23 = vpack.c.bf16 %v138_v22, %v137_v21  ;;  %v463_v26 = vpack.c.bf16 %v140_v25, %v139_v24  ;;  %v141_v27 = vld [vmem:[%s715_s3 + $0x70] sm:$0xff]  ;;  %v142_v28 = vld [vmem:[%s715_s3 + $0x78] sm:$0xff]  ;;  %v221_v30 = vld [vmem:[%s717_s5] sm:$0xff] }
  0x19   :  { %437 = vmatprep.mubr.msk.f32.mxu0 %vm523_vm0, %v524_v1  ;;  %v466_v29 = vpack.c.bf16 %v142_v28, %v141_v27  ;;  %v222_v31 = vld [vmem:[%s717_s5 + $0x8] sm:$0xff]  ;;  %v223_v32 = vld [vmem:[%s717_s5 + $0x10] sm:$0xff]  ;;  %v224_v34 = vld [vmem:[%s717_s5 + $0x18] sm:$0xff] }
  0x1a   :  { %449 = vmatpush3.bf16.msra.mxu1 %v448_v11  ;;  %v469_v33 = vpack.c.bf16 %v222_v31, %v221_v30  ;;  %v472_v35 = vpack.c.bf16 %v224_v34, %v223_v32  ;;  %v225_v36 = vld [vmem:[%s717_s5 + $0x20] sm:$0xff]  ;;  %v226_v37 = vld [vmem:[%s717_s5 + $0x28] sm:$0xff]  ;;  %v227_v39 = vld [vmem:[%s717_s5 + $0x30] sm:$0xff] }
  0x1b   :  { %450 = vmatprep.subr.bf16.mxu1 %v522_v0  ;;  %v475_v38 = vpack.c.bf16 %v226_v37, %v225_v36  ;;  %v228_v40 = vld [vmem:[%s717_s5 + $0x38] sm:$0xff]  ;;  %v229_v42 = vld [vmem:[%s717_s5 + $0x40] sm:$0xff]  ;;  %v230_v43 = vld [vmem:[%s717_s5 + $0x48] sm:$0xff] }
  0x1c   :  { %470 = vmatpush3.bf16.msra.mxu0 %v469_v33  ;;  %v478_v41 = vpack.c.bf16 %v228_v40, %v227_v39  ;;  %v481_v44 = vpack.c.bf16 %v230_v43, %v229_v42  ;;  %v231_v45 = vld [vmem:[%s717_s5 + $0x50] sm:$0xff]  ;;  %v232_v46 = vld [vmem:[%s717_s5 + $0x58] sm:$0xff]  ;;  %v233_v48 = vld [vmem:[%s717_s5 + $0x60] sm:$0xff] }
  0x1d   :  { %471 = vmatprep.subr.bf16.mxu0 %v522_v0  ;;  %v484_v47 = vpack.c.bf16 %v232_v46, %v231_v45  ;;  %v234_v49 = vld [vmem:[%s717_s5 + $0x68] sm:$0xff]  ;;  %v321_v51 = vld [vmem:[%s714_s2] ss:$0 sm:$0xff]  ;;  %v235_v56 = vld [vmem:[%s717_s5 + $0x70] sm:$0xff] }
  0x1e   :  { %452 = vmatpush3.bf16.msra.mxu1 %v451_v14  ;;  %v487_v50 = vpack.c.bf16 %v234_v49, %v233_v48  ;;  %v236_v57 = vld [vmem:[%s717_s5 + $0x78] sm:$0xff]  ;;  %v324_v59 = vld [vmem:[%s716_s4] ss:$0 sm:$0xff] }
  0x1f   :  { %453 = vmatprep.subr.bf16.mxu1 %v522_v0  ;;  %v490_v58 = vpack.c.bf16 %v236_v57, %v235_v56 }
  0x20   :  { %473 = vmatpush3.bf16.msra.mxu0 %v472_v35 }
  0x21   :  { %474 = vmatprep.subr.bf16.mxu0 %v522_v0 }
  0x22   :  { %455 = vmatpush3.bf16.msra.mxu1 %v454_v17 }
  0x23   :  { %456 = vmatprep.subr.bf16.mxu1 %v522_v0 }
  0x24   :  { %476 = vmatpush3.bf16.msra.mxu0 %v475_v38 }
  0x25   :  { %477 = vmatprep.subr.bf16.mxu0 %v522_v0 }
  0x26   :  { %458 = vmatpush3.bf16.msra.mxu1 %v457_v20 }
  0x27   :  { %459 = vmatprep.subr.bf16.mxu1 %v522_v0 }
  0x28   :  { %479 = vmatpush3.bf16.msra.mxu0 %v478_v41 }
  0x29   :  { %480 = vmatprep.subr.bf16.mxu0 %v522_v0 }
  0x2a   :  { %461 = vmatpush3.bf16.msra.mxu1 %v460_v23 }
  0x2b   :  { %462 = vmatprep.subr.bf16.mxu1 %v522_v0 }
  0x2c   :  { %482 = vmatpush3.bf16.msra.mxu0 %v481_v44 }
  0x2d   :  { %483 = vmatprep.subr.bf16.mxu0 %v522_v0 }
  0x2e   :  { %464 = vmatpush3.bf16.msra.mxu1 %v463_v26 }
  0x2f   :  { %465 = vmatprep.subr.bf16.mxu1 %v522_v0 }
  0x30   :  { %485 = vmatpush3.bf16.msra.mxu0 %v484_v47 }
  0x31   :  { %486 = vmatprep.subr.bf16.mxu0 %v522_v0 }
  0x32   :  { %467 = vmatpush3.bf16.msra.mxu1 %v466_v29 }
  0x34   :  { %488 = vmatpush3.bf16.msra.mxu0 %v487_v50 }
  0x35   :  { %489 = vmatprep.subr.bf16.mxu0 %v522_v0  ;;  %v325_v0 = vld [vmem:[%s718_s6] ss:$0 sm:$0xff] }
  0x38   :  { %491 = vmatpush3.bf16.msra.mxu0 %v490_v58 }
  0xeb   :  { %v122_v52 = vpop.f32.mrb[0].mxu0 }
  0xec   :  { %v123_v53 = vadd.f32 %v321_v51, %v122_v52  ;;  %v369_v54 = vpop.f32.mrb[1].mxu0 }
  0xee   :  { %v126_v55 = vmax.f32 %v123_v53, 0.0 }
  0xf0   :  { %403 = vmatmul.mubr.f32.vlgmr.msra.gmra.mrb[0].mxu1 %v126_v55 }
 0x1c3   :  { %v216_v60 = vpop.f32.mrb[0].mxu1 }
 0x1c4   :  { %v217_v61 = vadd.f32 %v324_v59, %v216_v60  ;;  %v404_v62 = vpop.f32.mrb[1].mxu1 }
 0x1c6   :  { %v220_v63 = vmax.f32 %v217_v61, 0.0 }
 0x1c8   :  { %438 = vmatmul.mubr.f32.vlgmr.msra.gmra.mrb[2].mxu0 %v220_v63 }
 0x29b   :  { %v310_v1 = vpop.f32.mrb[2].mxu0 }
 0x29c   :  { %v311_v2 = vadd.f32 %v325_v0, %v310_v1  ;;  %v439_v3 = vpop.f32.mrb[3].mxu0 }
 0x29e   :  { %315 = vst.msk [vmem:[%s719_s7] sm:$0xff] %vm314_vm5, %v311_v2 }
 0x29f   :  { %320 = vsyncpa [#allocation3], 1 }

</bundles_post_ra>
